<compile_context>
chip_gen: v6e
topology: v6e:2x2x1
jax: 0.10.0
libtpu: 0.0.40
codegen_flags: <defaults>
</compile_context>

<pallas_src>
import functools

import jax
import jax.numpy as jnp
from jax.experimental import pallas as pl
from jax.experimental.pallas import tpu as pltpu


def _round_up(x, m):
    return ((x + m - 1) // m) * m


def _choose_tiling(n):
    """Destination/source node tile size and padded node count."""
    if n >= 512:
        tm = 512                      # bigger tiles amortize per-step overhead
    elif n >= 256:
        tm = 256                      # multiple of 256 (v6e/v7x MXU), 2x128 (v5e)
    else:
        tm = _round_up(n, 16)         # bf16 sublane packing wants multiples of 16
    return tm, _round_up(n, tm)


# ---------------------------------------------------------------------------
# Kernel 1: fused lane-dense projection  H = X @ [W_0 | ... | W_{R-1} | W_self]
# ---------------------------------------------------------------------------
def _project_kernel(x_ref, w_ref, h_ref):
    h_ref[...] = jnp.dot(x_ref[...], w_ref[...],
                         preferred_element_type=jnp.float32).astype(h_ref.dtype)


def _project(x_pad, w_stack, *, tm):
    """x_pad: (Np, F_in), w_stack: (R+1, F_in, Fp) -> H: (R+1, Np, Fp)."""
    n_pad, f_in = x_pad.shape
    r1, _, fp = w_stack.shape
    nt = n_pad // tm
    return pl.pallas_call(
        _project_kernel,
        out_shape=jax.ShapeDtypeStruct((r1, n_pad, fp), x_pad.dtype),
        grid_spec=pltpu.PrefetchScalarGridSpec(
            num_scalar_prefetch=0,
            grid=(r1, nt),
            in_specs=[
                pl.BlockSpec((tm, f_in), lambda r, i: (i, 0)),
                # W[r] depends only on the outer axis -> stays VMEM-resident
                # for all nt inner steps (no re-DMA).
                pl.BlockSpec((pl.Squeezed(), f_in, fp), lambda r, i: (r, 0, 0)),
            ],
            out_specs=pl.BlockSpec((pl.Squeezed(), tm, fp),
                                   lambda r, i: (r, i, 0)),
        ),
        compiler_params=pltpu.CompilerParams(
            dimension_semantics=("parallel", "parallel"),
            vmem_limit_bytes=32 * 1024 * 1024),
    )(x_pad, w_stack)


# ---------------------------------------------------------------------------
# Kernel 2: per-relation aggregation + LayerNorm/bias/self-loop epilogue
# ---------------------------------------------------------------------------
def _rgcn_agg_kernel(a_ref, h_ref, hself_ref, gamma_ref, beta_ref, bias_ref,
                     out_ref, acc_ref, *, apply_relu, eps, inv_f):
    r = pl.program_id(1)
    k = pl.program_id(2)

    @pl.when((r == 0) & (k == 0))
    def _():
        acc_ref[...] = jnp.zeros_like(acc_ref)

    # acc[i] += A[r, i, k] @ H[r, k]   (bf16 operands, f32 accumulation)
    acc_ref[...] += jnp.dot(a_ref[...], h_ref[...],
                            preferred_element_type=jnp.float32)

    @pl.when((r == pl.num_programs(1) - 1) & (k == pl.num_programs(2) - 1))
    def _():
        h = acc_ref[...]
        # One-pass LayerNorm over the true F_out features (padded columns of
        # acc are exactly zero, so sums over the padded width are unchanged).
        s = jnp.sum(h, axis=-1, keepdims=True)
        sq = jnp.sum(h * h, axis=-1, keepdims=True)
        mean = s * inv_f
        var = jnp.maximum(sq * inv_f - mean * mean, 0.0)
        y = (h - mean) * jax.lax.rsqrt(var + eps)
        y = y * gamma_ref[...] + beta_ref[...] + bias_ref[...]
        # + self-loop embedding (precomputed X @ W_self tile)
        y = y + hself_ref[...].astype(jnp.float32)
        if apply_relu:
            y = jnp.maximum(y, 0.0)
        out_ref[...] = y.astype(out_ref.dtype)


def rgcn_layer_pallas(a_pad, x, weight, weight_self_loop, bias, ln_gamma,
                      ln_beta, *, apply_relu, tm,
                      compute_dtype=jnp.bfloat16, eps=1e-5):
    """One RGCNLayer forward.

    a_pad:  (R, Np, Np)  dense per-relation row-normalized adjacency
            (already padded to Np and cast to compute_dtype)
    x:      (N, F_in)    f32 node features
    weight: (R, F_in, F_out)  (already basis-combined if num_bases < R)
    """
    num_rels, n_pad, _ = a_pad.shape
    n, f_in = x.shape
    f_out = weight.shape[2]
    fp = _round_up(f_out, 128)            # lane-dense feature width
    nt = n_pad // tm                      # destination-node tiles
    tk = tm                               # source-node tile (same size)
    kt = n_pad // tk                      # source-node tiles

    # Stack + pad weights: relations 0..R-1, slab R = self-loop weight.
    w_stack = jnp.zeros((num_rels + 1, f_in, fp), jnp.float32)
    w_stack = w_stack.at[:num_rels, :, :f_out].set(weight)
    w_stack = w_stack.at[num_rels, :, :f_out].set(weight_self_loop)
    w_stack = w_stack.astype(compute_dtype)

    x_pad = jnp.zeros((n_pad, f_in), jnp.float32).at[:n].set(x)
    x_pad = x_pad.astype(compute_dtype)

    # Fused projection: H[:R] are the per-relation features, H[R] is self-loop.
    h_all = _project(x_pad, w_stack, tm=tm)          # (R+1, Np, Fp)

    gamma_p = jnp.ones((1, fp), jnp.float32).at[0, :f_out].set(ln_gamma)
    beta_p = jnp.zeros((1, fp), jnp.float32).at[0, :f_out].set(ln_beta)
    bias_p = jnp.zeros((1, fp), jnp.float32).at[0, :f_out].set(bias)

    kernel = functools.partial(_rgcn_agg_kernel, apply_relu=apply_relu,
                               eps=eps, inv_f=1.0 / f_out)

    out_pad = pl.pallas_call(
        kernel,
        out_shape=jax.ShapeDtypeStruct((n_pad, fp), jnp.float32),
        grid_spec=pltpu.PrefetchScalarGridSpec(
            num_scalar_prefetch=0,
            grid=(nt, num_rels, kt),
            in_specs=[
                # A[r] (dst-tile, src-tile) block, streamed in compute_dtype.
                pl.BlockSpec((pl.Squeezed(), tm, tk),
                             lambda i, r, k: (r, i, k)),
                # Projected features for relation r, source tile k.
                pl.BlockSpec((pl.Squeezed(), tk, fp),
                             lambda i, r, k: (r, k, 0)),
                # Self-loop tile (slab index num_rels), constant across r, k.
                pl.BlockSpec((pl.Squeezed(), tm, fp),
                             lambda i, r, k: (num_rels, i, 0)),
                pl.BlockSpec((1, fp), lambda i, r, k: (0, 0)),   # gamma
                pl.BlockSpec((1, fp), lambda i, r, k: (0, 0)),   # beta
                pl.BlockSpec((1, fp), lambda i, r, k: (0, 0)),   # bias
            ],
            # Output block index depends only on the dst-tile axis -> stays
            # resident (accumulator) across the (r, k) reduction axes.
            out_specs=pl.BlockSpec((tm, fp), lambda i, r, k: (i, 0)),
            scratch_shapes=[pltpu.VMEM((tm, fp), jnp.float32)],
        ),
        compiler_params=pltpu.CompilerParams(
            # dst-tile axis shards across TensorCores (megacore);
            # relation and source-tile axes are the reduction axes.
            dimension_semantics=("parallel", "arbitrary", "arbitrary"),
            # Safe on v7x's 64 MiB, raises v5e's 16 MiB default; the tiles
            # above are sized well under this even when double-buffered.
            vmem_limit_bytes=32 * 1024 * 1024),
    )(a_pad, h_all, h_all, gamma_p, beta_p, bias_p)

    return out_pad[:n, :f_out]


# ---------------------------------------------------------------------------
# Glue: parameters, basis combination, dense adjacency, multi-layer RGCN
# ---------------------------------------------------------------------------
def _xavier_uniform(key, shape, gain):
    fan_in, fan_out = shape[-2], shape[-1]
    bound = gain * (6.0 / (fan_in + fan_out)) ** 0.5
    return jax.random.uniform(key, shape, jnp.float32, -bound, bound)


def init_rgcn_params(key, in_feats, out_feats, num_layers, num_rels,
                     num_bases):
    gain = 2.0 ** 0.5  # relu gain
    shapes = [in_feats] + [out_feats] * num_layers
    params = []
    for i in range(num_layers):
        fi, fo = shapes[i], shapes[i + 1]
        key, k1, k2, k3 = jax.random.split(key, 4)
        nb = num_rels if (num_bases is None or num_bases > num_rels
                          or num_bases < 0) else num_bases
        layer = {
            "weight": _xavier_uniform(k1, (nb, fi, fo), gain),
            "alpha": (_xavier_uniform(k2, (num_rels, nb), gain)
                      if nb < num_rels else None),
            "bias": jnp.zeros((fo,), jnp.float32),
            "weight_self_loop": _xavier_uniform(k3, (fi, fo), gain),
            "ln_gamma": jnp.ones((fo,), jnp.float32),
            "ln_beta": jnp.zeros((fo,), jnp.float32),
            "in_feats": fi,
            "out_feats": fo,
            "num_rels": num_rels,
        }
        params.append(layer)
    return params


def _combined_weight(layer):
    w = layer["weight"]
    if layer["alpha"] is not None:
        nb = w.shape[0]
        w = jnp.matmul(layer["alpha"], w.reshape(nb, -1))
        w = w.reshape(layer["num_rels"], layer["in_feats"], layer["out_feats"])
    return w


def build_dense_adjacency(edge_index, edge_type, num_nodes, num_rels):
    """Row-normalized (unit-weight) adjacency per relation: A[r, dst, src]."""
    row, col = edge_index[0], edge_index[1]
    deg = jnp.zeros((num_nodes,), jnp.float32).at[row].add(1.0)
    w = 1.0 / deg[row]
    A = jnp.zeros((num_rels, num_nodes, num_nodes), jnp.float32)
    A = A.at[edge_type, row, col].add(w)
    return A


def rgcn_forward_pallas(A, x, params, *, compute_dtype=jnp.bfloat16):
    n = x.shape[0]
    num_rels = A.shape[0]
    tm, n_pad = _choose_tiling(n)
    a_pad = jnp.zeros((num_rels, n_pad, n_pad), jnp.float32)
    a_pad = a_pad.at[:, :n, :n].set(A).astype(compute_dtype)

    h = x
    for i, layer in enumerate(params):
        w = _combined_weight(layer)
        h = rgcn_layer_pallas(
            a_pad, h, w, layer["weight_self_loop"], layer["bias"],
            layer["ln_gamma"], layer["ln_beta"],
            apply_relu=(i < len(params) - 1), tm=tm,
            compute_dtype=compute_dtype)
    return h


# Pure-JAX reference (for correctness check only).
def rgcn_forward_ref(A, x, params, eps=1e-5):
    h = x
    for i, layer in enumerate(params):
        w = _combined_weight(layer)
        hr = jnp.einsum("ni,rio->rno", h, w)
        msg = jnp.einsum("rnm,rmo->no", A, hr)
        mean = jnp.mean(msg, axis=-1, keepdims=True)
        var = jnp.mean((msg - mean) ** 2, axis=-1, keepdims=True)
        y = (msg - mean) / jnp.sqrt(var + eps)
        y = y * layer["ln_gamma"] + layer["ln_beta"] + layer["bias"]
        y = y + h @ layer["weight_self_loop"]
        h = jnp.maximum(y, 0.0) if i < len(params) - 1 else y
    return h


# ---------------------------------------------------------------------------
if __name__ == "__main__":
    key = jax.random.PRNGKey(0)

    # -------- Test 1: small, deterministic problem (single dst/src tile) ----
    N, F_IN, F_OUT = 32, 16, 32
    NUM_RELS, NUM_BASES, NUM_LAYERS, E = 4, 2, 2, 96

    key, kx, krow, kcol, ktyp, kparam = jax.random.split(key, 6)
    x = jax.random.normal(kx, (N, F_IN), jnp.float32)
    row = jax.random.randint(krow, (E,), 0, N)
    col = jax.random.randint(kcol, (E,), 0, N)
    edge_type = jax.random.randint(ktyp, (E,), 0, NUM_RELS)
    edge_index = jnp.stack([row, col])

    A = build_dense_adjacency(edge_index, edge_type, N, NUM_RELS)
    params = init_rgcn_params(kparam, F_IN, F_OUT, NUM_LAYERS, NUM_RELS,
                              NUM_BASES)
    ref = rgcn_forward_ref(A, x, params)

    # f32 compute path: tight structural/numerical check of the kernels.
    out_f32 = jax.block_until_ready(
        rgcn_forward_pallas(A, x, params, compute_dtype=jnp.float32))
    assert out_f32.shape == (N, F_OUT)
    assert jnp.allclose(out_f32, ref, atol=2e-3, rtol=2e-3), (
        float(jnp.max(jnp.abs(out_f32 - ref))))

    # bf16 streaming path (the bandwidth-optimized configuration).
    out_bf16 = jax.block_until_ready(
        rgcn_forward_pallas(A, x, params, compute_dtype=jnp.bfloat16))
    assert out_bf16.shape == (N, F_OUT)
    assert bool(jnp.all(jnp.isfinite(out_bf16)))
    assert float(jnp.max(jnp.abs(out_bf16 - ref))) < 0.5

    # -------- Test 2: multi-tile / multi-source-tile / padded path ----------
    N2, E2 = 300, 1200   # -> tm=256, Np=512: 2 dst tiles x 2 src tiles
    key, kx2, krow2, kcol2, ktyp2, kparam2 = jax.random.split(key, 6)
    x2 = jax.random.normal(kx2, (N2, F_IN), jnp.float32)
    row2 = jax.random.randint(krow2, (E2,), 0, N2)
    col2 = jax.random.randint(kcol2, (E2,), 0, N2)
    etype2 = jax.random.randint(ktyp2, (E2,), 0, NUM_RELS)
    A2 = build_dense_adjacency(jnp.stack([row2, col2]), etype2, N2, NUM_RELS)
    params2 = init_rgcn_params(kparam2, F_IN, F_OUT, NUM_LAYERS, NUM_RELS,
                               NUM_BASES)
    ref2 = rgcn_forward_ref(A2, x2, params2)
    out2 = jax.block_until_ready(
        rgcn_forward_pallas(A2, x2, params2, compute_dtype=jnp.float32))
    assert out2.shape == (N2, F_OUT)
    assert jnp.allclose(out2, ref2, atol=2e-3, rtol=2e-3), (
        float(jnp.max(jnp.abs(out2 - ref2))))

    # TODO(synk): dropout / self_dropout are identity here (p=0.0, eval mode).
    print("KERNEL_OK")
</pallas_src>

<mosaic_0001>
module attributes {stable_mosaic.version = 11 : i64} {
  func.func @_project_kernel(%arg0: i32, %arg1: i32, %arg2: memref<32x16xf32, #tpu.memory_space<vmem>>, %arg3: memref<1x16x128xf32, #tpu.memory_space<vmem>>, %arg4: memref<1x32x128xf32, #tpu.memory_space<vmem>>) attributes {dimension_semantics = [#tpu.dimension_semantics<parallel>, #tpu.dimension_semantics<parallel>], iteration_bounds = array<i64: 5, 1>, scalar_prefetch = 0 : i64, scratch_operands = 0 : i64, tpu.core_type = #tpu.core_type<tc>, window_params = [{transform_indices = @transform_0, window_bounds = array<i64: 32, 16>}, {transform_indices = @transform_1, window_bounds = array<i64: 1, 16, 128>}, {transform_indices = @transform_2, window_bounds = array<i64: 1, 32, 128>}]} {
    %c0 = arith.constant 0 : index
    %c0_0 = arith.constant 0 : index
    %0 = vector.load %arg2[%c0, %c0_0] : memref<32x16xf32, #tpu.memory_space<vmem>>, vector<32x16xf32>
    %c0_1 = arith.constant 0 : index
    %c0_2 = arith.constant 0 : index
    %c0_3 = arith.constant 0 : index
    %1 = vector.load %arg3[%c0_1, %c0_2, %c0_3] : memref<1x16x128xf32, #tpu.memory_space<vmem>>, vector<1x16x128xf32>
    %2 = vector.shape_cast %1 : vector<1x16x128xf32> to vector<16x128xf32>
    %cst = arith.constant dense<0.000000e+00> : vector<32x128xf32>
    %3 = tpu.matmul %0, %2, %cst {dimension_numbers = #tpu.dot_dimension_numbers<[1], [0], [0], [1], [0, 0, 1, 1], [], []>} : vector<32x16xf32>, vector<16x128xf32>, vector<32x128xf32> -> vector<32x128xf32>
    %c0_4 = arith.constant 0 : index
    %c0_5 = arith.constant 0 : index
    %c0_6 = arith.constant 0 : index
    %4 = vector.load %arg4[%c0_4, %c0_5, %c0_6] : memref<1x32x128xf32, #tpu.memory_space<vmem>>, vector<1x32x128xf32>
    %5 = vector.shape_cast %4 : vector<1x32x128xf32> to vector<32x128xf32>
    %6 = vector.shape_cast %3 : vector<32x128xf32> to vector<1x32x128xf32>
    tpu.vector_store %arg4[%c0_4, %c0_5, %c0_6], %6 {strides = array<i32>} : memref<1x32x128xf32, #tpu.memory_space<vmem>>, vector<1x32x128xf32>,
    return
  }
  func.func @transform_0(%arg0: i32, %arg1: i32) -> (i32, i32) {
    %c0_i32 = arith.constant 0 : i32
    %c0_i32_0 = arith.constant 0 : i32
    return %arg1, %c0_i32 : i32, i32
  }
  func.func @transform_1(%arg0: i32, %arg1: i32) -> (i32, i32, i32) {
    %c0_i32 = arith.constant 0 : i32
    %c0_i32_0 = arith.constant 0 : i32
    %c0_i32_1 = arith.constant 0 : i32
    return %arg0, %c0_i32, %c0_i32_0 : i32, i32, i32
  }
  func.func @transform_2(%arg0: i32, %arg1: i32) -> (i32, i32, i32) {
    %c0_i32 = arith.constant 0 : i32
    %c0_i32_0 = arith.constant 0 : i32
    return %arg0, %arg1, %c0_i32 : i32, i32, i32
  }
}

</mosaic_0001>

<bundles_post_ra>
// kernel: tpu_custom_call.1
= control target key start
LH: loop header
LB: loop body
LE: loop exit
PB: predicated region body
PF: predicated region fallthrough
CT: control target
= control target key end

     0   :  { %7 = vsyncpa [#allocation3], 0  ;;  %s818_s0 = inlined_call_operand.vmem [shape: f32[32,16], index: 0, kind: input, shape index: {}]   ;;  %s819_s1 = inlined_call_operand.hbm [shape: f32[5,16,128], index: 1, kind: input, shape index: {}]   ;;  %s820_s2 = inlined_call_operand.hbm [shape: f32[5,32,128], index: 2, kind: output, shape index: {}]  }
   0x1   :  { %9 = vsyncpa [#allocation3 + $0x1], 0 }
   0x2   :  { %10 = vsyncpa [#allocation4], 0 }
   0x3   :  { %12 = vsyncpa [#allocation4 + $0x1], 0  ;;  %s661_s9 = smov 0   ;;  %s663_s10 = smov 0  }
   0x4   :  { %s665_s11 = smov 0   ;;  %s667_s12 = smov 0  }
   0x5   :  { %s669_s13 = smov 0   ;;  %s671_s14 = smov 0  }
   0x6 LB: > { %s422_s15 = sadd.s32 4294967295, %s638_s14   ;;  %s423_s16 = sadd.s32 4294967294, %s638_s14   ;;  %s638_s14 = sphi %s671_s14, %s18_s14   ;;  %s634_s13 = sphi %s669_s13, %s830_s13   ;;  %s630_s12 = sphi %s667_s12, %s829_s12   ;;  %s626_s11 = sphi %s665_s11, %s828_s11   ;;  %s622_s10 = sphi %s663_s10, %s827_s10   ;;  %s618_s9 = sphi %s661_s9, %s826_s9  }
   0x7   : > { %s30_s17 = sadd.s32 1, %s634_s13  ;;  %s63_s18 = sadd.s32 1, %s626_s11 }
   0x8   : > { %p32_p0 = scmp.ge.s32.totalorder %s30_s17, 5  ;;  %p70_p1 = scmp.ne.s32.totalorder %s626_s11, %s622_s10 }
   0x9   : > { %p71_p2 = scmp.eq.s32.totalorder %s638_s14, 0  ;;  %p76_p3 = scmp.ne.s32.totalorder %s622_s10, %s618_s9 }
   0xa   : > { %s832_s17 = smov (%p32_p0, %s30_s17), 0  ;;  %p77_p5 = scmp.eq.s32.totalorder %s422_s15, 0 }
   0xb   : > { %p702_p4 = por %p71_p2, %p70_p1  ;;  %s60_s20 = ssub.s32 %s634_s13, %s832_s17 }
   0xc   : > { %p102_p6 = scmp.eq.s32.totalorder %s422_s15, 4  ;;  %p61_p7 = scmp.eq.s32.totalorder %s60_s20, 0 }
   0xd   : > { %p708_p8 = por %p77_p5, %p76_p3  ;;  %p108_p10 = scmp.eq.s32.totalorder %s423_s16, 4 }
   0xe   : > { %p712_p9 = por %p102_p6, %p70_p1  ;;  %p476_p12 = scmp.lt.s32.totalorder %s638_s14, 5 }
   0xf   : > { %s717_s23 = scalar_select %p61_p7, %s626_s11, %s63_s18  }
  0x10   : > { %p719_p11 = por %p108_p10, %p76_p3  ;;  %s137_s25 = sand.u32 1, %s626_s11  }
  0x11   : > { %s427_s26 = sshll.u32 %s137_s25, 4  ;;  %s442_s27 = sshll.u32 %s634_s13, 8 }
  0x12   : > { %s147_s30 = scalar_lea.hbm %s819_s1, %s442_s27  ;;  %s141_s3 = scalar_lea.vmem [#allocation2], %s427_s26 }
  0x13   : > { %s148_s4 = sshll.u32 %s141_s3, 4  ;;  %p731_p13 = pnand %p476_p12, %p702_p4  ;;  %s149_s4 = int_to_ptr.vmem [resolvable:$true] %s148_s4 }
  0x14   : > { %p430_p0 = scmp.ge.s32.totalorder %s638_s14, 1  ;;  %s138_s6 = scalar_lea.sflag [#allocation3], %s137_s25 }
  0x15   : > { %p532_p1 = pneg %p731_p13  ;;  %s543_s7 = scalar_lea.vmem %s149_s4, 256 }
  0x16   : > { %p544_p2 = scmp.ne.s32.totalorder %s149_s4, %s543_s7  ;;  %s640_s8 = smov [#allocation2]  }
  0x17   : > { %s548_s15 = sshll.u32 %s640_s8, 4  ;;  %s549_s15 = int_to_ptr.vmem [resolvable:$false] %s548_s15 }
  0x18   : > { %p546_p3 = pnand %p544_p2, %p532_p1  ;;  %s550_s16 = scalar_lea.vmem %s549_s15, 512 }
  0x19   : > { %p551_p6 = scmp.lt.s32.totalorder %s149_s4, %s549_s15  ;;  %p552_p7 = scmp.lt.s32.totalorder %s550_s16, %s543_s7 }
  0x1a   : > { %p547_p5 = pneg %p546_p3 }
  0x1b   : > { %p553_p10 = por %p552_p7, %p551_p6 }
  0x1d   : > { %p554_p4 = pnand %p553_p10, %p547_p5 }
  0x1f   : > { %557 = shalt.err (!%p554_p4)
}
  0x20   : > { %s641_s18 = smov 128   ;;  %s642_s19 = smov 8  }
  0x21   : > { %471 = dma.hbm_to_vmem [thread:$0]  (!%p731_p13), %s147_s30, 256, %s149_s4, %s138_s6, %s641_s18, %s641_s18, %s642_s19  }
  0x22   : > { %p156_p12 = scmp.lt.s32.totalorder %s638_s14, 6 }
  0x24   : > { %p157_p1 = pnand %p430_p0, %p156_p12 }
  0x25   : > { %s744_s20 = sand.u32 (!%p157_p1), 1, %s622_s10  }
  0x26   : > { %160 = sbr.rel (%p157_p1) target bundleno = 259 (0x103), region = 28  ;;  %s431_s25 = sshll.u32 (!%p157_p1), %s744_s20, 4 }
  0x27   : > { %s163_s26 = scalar_lea.sflag (!%p157_p1), [#allocation3], %s744_s20  ;;  %s166_s27 = scalar_lea.vmem (!%p157_p1), [#allocation2], %s431_s25 }
  0x2b   : > { %609 = dma.done.wait (%p708_p8), %s163_s26, 256  }
  0x2c   : > { %611 = vsyncadd (%p708_p8), %s163_s26, 4294967040  ;;  %v204_v0 = vld [vmem:[%s166_s27 + $0x8] sm:$0xff]  ;;  %v203_v1 = vld [vmem:[%s166_s27] sm:$0xff]  ;;  %vm205_vm0 = vcmask 130048   ;;  %s432_s7 = sshll.u32 %s744_s20, 5  ;;  %s443_s16 = sshll.u32 %s630_s12, 9 }
  0x2d   : > { %450 = vmatprep.subr.mxu0 %v204_v0  ;;  %460 = vmatprep.subr.mxu1 %v204_v0  ;;  %v199_v2 = vld [vmem:[%s818_s0] sm:$0xff]  ;;  %v201_v3 = vld [vmem:[%s818_s0 + $0x10] sm:$0xff]  ;;  %v200_v4 = vld [vmem:[%s818_s0 + $0x8] sm:$0xff]  ;;  %s191_s8 = scalar_lea.vmem [#allocation5], %s432_s7  ;;  %s771_s25 = scalar_lea.hbm %s820_s2, %s443_s16 }
  0x2e   : > { %451 = vmatpush3.msra.mxu0 %v204_v0  ;;  %462 = vmatpush3.msra.mxu1 %v204_v0  ;;  %v202_v5 = vld [vmem:[%s818_s0 + $0x18] sm:$0xff]  ;;  %s323_s15 = sshll.u32 %s191_s8, 4  ;;  %s308_s26 = scalar_lea.sflag [#allocation4], %s744_s20  ;;  %s766_s15 = int_to_ptr.vmem [resolvable:$true] %s323_s15 }
  0x2f   : > { %452 = vmatprep.subr.mxu0 %v203_v1  ;;  %461 = vmatprep.subr.mxu1 %v203_v1  ;;  %s558_s12 = scalar_lea.vmem %s766_s15, 512  ;;  %s643_s27 = smov [#allocation5]  }
  0x30   : > { %453 = vmatpush3.msra.mxu0 %v203_v1  ;;  %463 = vmatpush3.msra.mxu1 %v203_v1  ;;  %p559_p8 = scmp.ne.s32.totalorder %s766_s15, %s558_s12  ;;  %s562_s28 = sshll.u32 %s643_s27, 4  ;;  %s563_s28 = int_to_ptr.vmem [resolvable:$false] %s562_s28 }
  0x31   : > { %454 = vmatprep.mubr.msk.f32.mxu0 %vm205_vm0, %v199_v2  ;;  %457 = vmatprep.mubr.msk.f32.mxu1 %vm205_vm0, %v201_v3  ;;  %s564_s29 = scalar_lea.vmem %s563_s28, 1024  ;;  %p565_p2 = scmp.lt.s32.totalorder %s766_s15, %s563_s28 }
  0x32   : > { %455 = vmatmul.mubr.msk.f32.vlgmr.msra.gmra.mxu0 %vm205_vm0, %v200_v4  ;;  %458 = vmatmul.mubr.msk.f32.vlgmr.msra.gmra.mxu1 %vm205_vm0, %v202_v5  ;;  %p560_p13 = pnand %p559_p8, %p712_p9  ;;  %p566_p3 = scmp.lt.s32.totalorder %s564_s29, %s558_s12 }
  0x34   : > { %p561_p0 = pneg %p560_p13  ;;  %p567_p5 = por %p566_p3, %p565_p2 }
  0x36   : > { %p568_p6 = pnand %p567_p5, %p561_p0 }
  0xf2   : > { %v456_v6 = vpop.f32.mrf.mxu0  ;;  %v459_v7 = vpop.f32.mrf.mxu1 }
  0xf3   : > { %304 = vst [vmem:[%s191_s8 + $0x8] sm:$0xff] %v456_v6  ;;  %306 = vst [vmem:[%s191_s8 + $0x18] sm:$0xff] %v459_v7 }
  0xf4   : > { %v284_v8 = vpop.f32.mrf.mxu0  ;;  %v294_v9 = vpop.f32.mrf.mxu1 }
  0xf5   : > { %303 = vst [vmem:[%s191_s8] sm:$0xff] %v284_v8  ;;  %305 = vst [vmem:[%s191_s8 + $0x10] sm:$0xff] %v294_v9 }
  0xf6   : > { %571 = shalt.err (!%p568_p6)
}
  0xf7   : > { %s572_s30 = scalar_lea.hbm %s771_s25, 512  ;;  %s576_s4 = scalar_lea.hbm %s820_s2, 2560 }
  0xf8   : > { %p573_p7 = scmp.ne.s32.totalorder %s771_s25, %s572_s30  ;;  %p577_p12 = scmp.lt.s32.totalorder %s771_s25, %s820_s2 }
  0xf9   : > { %p578_p1 = scmp.lt.s32.totalorder %s576_s4, %s572_s30 }
  0xfa   : > { %p574_p10 = pnand %p573_p7, %p712_p9 }
  0xfb   : > { %p579_p8 = por %p578_p1, %p577_p12 }
  0xfc   : > { %p575_p4 = pneg %p574_p10 }
  0xfe   : > { %p580_p13 = pnand %p579_p8, %p575_p4 }
 0x100   : > { %583 = shalt.err (!%p580_p13)
}
 0x101   : > { %s644_s7 = smov 128   ;;  %s645_s8 = smov 8  }
 0x102   : > { %466 = dma.vmem_to_hbm [thread:$0]  (%p712_p9), %s766_s15, 512, %s771_s25, %s308_s26, %s644_s7, %s644_s7, %s645_s8  }
 0x103 PF: > { %p477_p0 = scmp.ge.s32.totalorder %s638_s14, 2  ;;  %s338_s16 = sand.u32 1, %s618_s9  }
 0x104   : > { %s339_s18 = scalar_lea.sflag [#allocation4], %s338_s16 }
 0x105   : > { %p473_p2 = pnand %p477_p0, %p719_p11 }
 0x107   : > { %p474_p3 = pneg %p473_p2 }
 0x109   : > { %613 = dma.done.wait (%p474_p3), %s339_s18, 512  }
 0x10a   : > { %615 = vsyncadd (%p474_p3), %s339_s18, 4294966784  ;;  %s18_s14 = sadd.s32 1, %s638_s14   ;;  %s826_s9 = smov %s622_s10 }
 0x10b   : > { %p15_p5 = scmp.ge.s32.totalorder %s18_s14, 7   ;;  %s827_s10 = smov %s626_s11 }
 0x10c   : > { %s828_s11 = smov %s717_s23  ;;  %s829_s12 = smov %s634_s13 }
 0x10d   : > { %s830_s13 = smov %s832_s17  ;;  %17 = sbr.rel (!%p15_p5) target bundleno = 6 (0x6), region = 76 }
 0x112   :  { %344 = vsyncpa [#allocation3], 1 }
 0x113   :  { %346 = vsyncpa [#allocation3 + $0x1], 1 }
 0x114   :  { %347 = vsyncpa [#allocation4], 1 }
 0x115   :  { %349 = vsyncpa [#allocation4 + $0x1], 1 }

</bundles_post_ra>
